<compile_context>
chip_gen: v7x
topology: tpu7x:2x2x1
jax: 0.10.0
libtpu: 0.0.40
codegen_flags: <defaults>
</compile_context>

<pallas_src>
import functools

import numpy as np
import jax
import jax.numpy as jnp
from jax.experimental import pallas as pl
from jax.experimental.pallas import tpu as pltpu


# Conservative per-pipeline VMEM budget (inputs x double-buffers), safe on v7x.
_VMEM_BUDGET = 12 * 1024 * 1024
_VMEM_LIMIT = 32 * 1024 * 1024   # explicit scoped-VMEM limit, valid on all gens


# ----------------------------------------------------------------------------
# Tile-size helpers
# ----------------------------------------------------------------------------
def _pick_row_tile(h, per_row_bytes, budget=_VMEM_BUDGET):
    """Largest divisor of h that is a multiple of 8 (or == h) within budget."""
    legal = [d for d in range(1, h + 1)
             if h % d == 0 and (d == h or d % 8 == 0)]
    fitting = [d for d in legal if d * per_row_bytes <= budget]
    return max(fitting) if fitting else min(legal)


def _pick_group(n, per_unit_bytes, budget=_VMEM_BUDGET, max_group=8):
    """Largest divisor of n (<= max_group) whose block fits the VMEM budget."""
    best = 1
    for p in range(1, min(n, max_group) + 1):
        if n % p == 0 and p * per_unit_bytes <= budget:
            best = p
    return best


# ----------------------------------------------------------------------------
# Pallas kernels
# ----------------------------------------------------------------------------
def _blur_field_loss_kernel(p_ref, t_ref, o_ref, *, inv_n_total, inv_n_pix,
                            lambda_dir, lambda_mag, eps):
    # p_ref / t_ref: (1, 3, TILE_H, W) f32 VMEM blocks; o_ref: (1, 1) f32 SMEM.
    p0, p1, p2 = p_ref[0, 0], p_ref[0, 1], p_ref[0, 2]
    t0, t1, t2 = t_ref[0, 0], t_ref[0, 1], t_ref[0, 2]

    # Charbonnier over all channels (L1 term) and over magnitude (channel 2).
    d0, d1, d2 = p0 - t0, p1 - t1, p2 - t2
    c0 = jnp.sqrt(d0 * d0 + eps)
    c1 = jnp.sqrt(d1 * d1 + eps)
    c2 = jnp.sqrt(d2 * d2 + eps)
    sum_mag = jnp.sum(c2)
    sum_all = jnp.sum(c0) + jnp.sum(c1) + sum_mag

    # Direction (cosine-similarity) loss over channels 0/1, rsqrt form.
    # (PyTorch adds 1e-8 to the norm; rsqrt(n^2 + 1e-16) matches to < 1e-8 rel
    #  for non-degenerate vectors.)
    eps2 = 1e-16
    inv_p = jax.lax.rsqrt(p0 * p0 + p1 * p1 + eps2)
    inv_t = jax.lax.rsqrt(t0 * t0 + t1 * t1 + eps2)
    cos = (p0 * t0 + p1 * t1) * (inv_p * inv_t)
    sum_dir = jnp.sum(1.0 - cos)

    # Fold the (linear) normalizations in so a single scalar partial suffices.
    o_ref[0, 0] = (sum_all * inv_n_total
                   + lambda_dir * sum_dir * inv_n_pix
                   + lambda_mag * sum_mag * inv_n_pix)


def _resize_kernel(a_ref, bt_ref, x_ref, o_ref, *, planes_per_step):
    # a_ref: (Ho, Hi) bf16, bt_ref: (Wi, Wo) bf16, x_ref: (P, Hi, Wi) bf16,
    # o_ref: (P, Ho, Wo) f32.   out[p] = A @ x[p] @ B^T  (MXU, f32 accumulate).
    for i in range(planes_per_step):
        tmp = jnp.dot(a_ref[...], x_ref[i], preferred_element_type=jnp.float32)
        o_ref[i] = jnp.dot(tmp.astype(jnp.bfloat16), bt_ref[...],
                           preferred_element_type=jnp.float32)


def _upsample_charbonnier_kernel(a_ref, bt_ref, x_ref, y_ref, o_ref, *,
                                 planes_per_step, eps):
    # Fused bilinear upsample + Charbonnier partial sum (no HBM round trip of
    # the upsampled tensor).  x_ref: (P, h, w) bf16 low-res planes,
    # y_ref: (P, H, W) f32 high-res planes, o_ref: (1, 1) f32 SMEM partial.
    total = jnp.float32(0.0)
    for i in range(planes_per_step):
        up = jnp.dot(a_ref[...], x_ref[i], preferred_element_type=jnp.float32)
        up = jnp.dot(up.astype(jnp.bfloat16), bt_ref[...],
                     preferred_element_type=jnp.float32)
        d = up - y_ref[i]
        total = total + jnp.sum(jnp.sqrt(d * d + eps))
    o_ref[0, 0] = total


# ----------------------------------------------------------------------------
# Wrappers
# ----------------------------------------------------------------------------
def blur_field_loss(pred, target, lambda_dir=0.5, lambda_mag=0.5, eps=1e-6):
    """BlurFieldLoss.forward(pred, target) for NCHW inputs with C == 3."""
    B, C, H, W = pred.shape
    assert C == 3, "BlurFieldLoss expects 3-channel blur fields"
    pred = pred.astype(jnp.float32)
    target = target.astype(jnp.float32)

    # Per tile row: 2 tensors x 2 pipeline buffers x 3 channels x W x 4B.
    tile_h = _pick_row_tile(H, per_row_bytes=48 * W)
    n_h = H // tile_h

    kernel = functools.partial(
        _blur_field_loss_kernel,
        inv_n_total=1.0 / float(B * C * H * W),
        inv_n_pix=1.0 / float(B * H * W),
        lambda_dir=float(lambda_dir), lambda_mag=float(lambda_mag),
        eps=float(eps))

    partials = pl.pallas_call(
        kernel,
        grid=(B, n_h),
        out_shape=jax.ShapeDtypeStruct((B, n_h), jnp.float32),
        in_specs=[
            pl.BlockSpec((1, 3, tile_h, W), lambda b, h: (b, 0, h, 0)),
            pl.BlockSpec((1, 3, tile_h, W), lambda b, h: (b, 0, h, 0)),
        ],
        out_specs=pl.BlockSpec((1, 1), lambda b, h: (b, h),
                               memory_space=pltpu.MemorySpace.SMEM),
        compiler_params=pltpu.CompilerParams(
            dimension_semantics=("parallel", "parallel"),
            vmem_limit_bytes=_VMEM_LIMIT),
    )(pred, target)
    return jnp.sum(partials)


def _bilinear_matrix(in_size, out_size):
    """PyTorch F.interpolate(mode='bilinear', align_corners=False) as a matrix."""
    scale = in_size / out_size
    dst = np.arange(out_size, dtype=np.float64)
    src = scale * (dst + 0.5) - 0.5
    src = np.maximum(src, 0.0)
    i0 = np.floor(src).astype(np.int64)
    i0 = np.minimum(i0, in_size - 1)
    i1 = np.minimum(i0 + 1, in_size - 1)
    w1 = src - i0
    w0 = 1.0 - w1
    m = np.zeros((out_size, in_size), dtype=np.float32)
    np.add.at(m, (np.arange(out_size), i0), w0)
    np.add.at(m, (np.arange(out_size), i1), w1)
    return m


def bilinear_resize(x, out_h, out_w):
    """F.interpolate(x, size=(out_h, out_w), mode='bilinear', align_corners=False)."""
    B, C, H, W = x.shape
    A = jnp.asarray(_bilinear_matrix(H, out_h)).astype(jnp.bfloat16)   # (Ho, H)
    Bt = jnp.asarray(_bilinear_matrix(W, out_w)).T.astype(jnp.bfloat16)  # (W, Wo)
    planes = x.reshape(B * C, H, W).astype(jnp.bfloat16)

    n = B * C
    per_plane = 2 * (H * W * 2 + out_h * out_w * 4)   # 2 buffers x (in + out)
    P = _pick_group(n, per_plane)
    kernel = functools.partial(_resize_kernel, planes_per_step=P)

    out = pl.pallas_call(
        kernel,
        grid=(n // P,),
        out_shape=jax.ShapeDtypeStruct((n, out_h, out_w), jnp.float32),
        in_specs=[
            pl.BlockSpec((out_h, H), lambda g: (0, 0)),
            pl.BlockSpec((W, out_w), lambda g: (0, 0)),
            pl.BlockSpec((P, H, W), lambda g: (g, 0, 0)),
        ],
        out_specs=pl.BlockSpec((P, out_h, out_w), lambda g: (g, 0, 0)),
        compiler_params=pltpu.CompilerParams(
            dimension_semantics=("parallel",),
            vmem_limit_bytes=_VMEM_LIMIT),
    )(A, Bt, planes)
    return out.reshape(B, C, out_h, out_w)


def upsample_charbonnier_loss(lower, higher, eps=1e-6):
    """CharbonnierLoss(F.interpolate(lower, size=higher.shape[2:]), higher),
    fused so the upsampled tensor never hits HBM."""
    B, C, h, w = lower.shape
    _, _, H2, W2 = higher.shape
    A = jnp.asarray(_bilinear_matrix(h, H2)).astype(jnp.bfloat16)    # (H2, h)
    Bt = jnp.asarray(_bilinear_matrix(w, W2)).T.astype(jnp.bfloat16)  # (w, W2)
    xs = lower.reshape(B * C, h, w).astype(jnp.bfloat16)
    ys = higher.reshape(B * C, H2, W2).astype(jnp.float32)

    n = B * C
    per_plane = 2 * (h * w * 2 + H2 * W2 * 4)
    P = _pick_group(n, per_plane)
    n_groups = n // P
    kernel = functools.partial(_upsample_charbonnier_kernel,
                               planes_per_step=P, eps=float(eps))

    partials = pl.pallas_call(
        kernel,
        grid=(n_groups,),
        out_shape=jax.ShapeDtypeStruct((n_groups, 1), jnp.float32),
        in_specs=[
            pl.BlockSpec((H2, h), lambda g: (0, 0)),
            pl.BlockSpec((w, W2), lambda g: (0, 0)),
            pl.BlockSpec((P, h, w), lambda g: (g, 0, 0)),
            pl.BlockSpec((P, H2, W2), lambda g: (g, 0, 0)),
        ],
        out_specs=pl.BlockSpec((1, 1), lambda g: (g, 0),
                               memory_space=pltpu.MemorySpace.SMEM),
        compiler_params=pltpu.CompilerParams(
            dimension_semantics=("parallel",),
            vmem_limit_bytes=_VMEM_LIMIT),
    )(A, Bt, xs, ys)
    return jnp.sum(partials) / float(B * C * H2 * W2)


def multi_scale_blur_field_loss(outputs, target, scale_weights=None,
                                use_consistency=True, consistency_weight=0.1):
    """MultiScaleBlurFieldLoss.forward(outputs, target)."""
    weights = scale_weights if scale_weights is not None else [0.25, 0.5, 1.0]
    if not isinstance(outputs, (list, tuple)):
        outputs = [outputs]

    was_tuple = [isinstance(o, tuple) and len(o) == 3 for o in outputs]
    preds = [jnp.concatenate(o, axis=1) if t else o
             for o, t in zip(outputs, was_tuple)]

    total_loss = jnp.float32(0.0)
    losses_dict = {}
    names = ["low", "medium", "high"]

    for i, pred in enumerate(preds):
        if i >= len(weights):
            break
        scale_factor = 0.25 * 2 ** i
        if scale_factor < 1.0:
            oh = int(target.shape[2] * scale_factor)
            ow = int(target.shape[3] * scale_factor)
            scaled_target = bilinear_resize(target, oh, ow)
        else:
            scaled_target = target
        scale_loss = blur_field_loss(pred, scaled_target)
        total_loss = total_loss + weights[i] * scale_loss
        name = names[i] if i < 3 else f"scale_{i}"
        losses_dict[f"loss_{name}"] = scale_loss

    if use_consistency:
        consistency_loss = jnp.float32(0.0)
        for i in range(len(preds) - 1):
            pair = upsample_charbonnier_loss(preds[i], preds[i + 1])
            if was_tuple[i]:
                # PyTorch tuple branch sums three per-channel means == 3x the
                # mean over the concatenated tensor (same upsample per channel).
                pair = 3.0 * pair
            consistency_loss = consistency_loss + pair
        total_loss = total_loss + consistency_weight * consistency_loss
        losses_dict["loss_consistency"] = consistency_loss

    losses_dict["loss_total"] = total_loss
    return total_loss, losses_dict


# ----------------------------------------------------------------------------
# Demo
# ----------------------------------------------------------------------------
if __name__ == "__main__":
    key = jax.random.PRNGKey(0)
    B, C, H, W = 2, 3, 16, 16
    k1, k2, k3, k4 = jax.random.split(key, 4)

    target = jax.random.normal(k1, (B, C, H, W), jnp.float32)
    # MIMO-UNet multi-scale outputs: quarter, half, full resolution.
    outputs = [
        jax.random.normal(k2, (B, C, H // 4, W // 4), jnp.float32),
        jax.random.normal(k3, (B, C, H // 2, W // 2), jnp.float32),
        jax.random.normal(k4, (B, C, H, W), jnp.float32),
    ]

    total, losses = multi_scale_blur_field_loss(outputs, target)
    total = jax.block_until_ready(total)
    jax.block_until_ready(losses)
    print("KERNEL_OK")
</pallas_src>

<mosaic_0001>
module attributes {stable_mosaic.version = 11 : i64} {
  func.func @_resize_kernel(%arg0: i32, %arg1: memref<4x16xbf16, #tpu.memory_space<vmem>>, %arg2: memref<16x4xbf16, #tpu.memory_space<vmem>>, %arg3: memref<6x16x16xbf16, #tpu.memory_space<vmem>>, %arg4: memref<6x4x4xf32, #tpu.memory_space<vmem>>) attributes {dimension_semantics = [#tpu.dimension_semantics<parallel>], iteration_bounds = array<i64: 1>, scalar_prefetch = 0 : i64, scratch_operands = 0 : i64, tpu.core_type = #tpu.core_type<tc>, window_params = [{pipeline_mode = #tpu.pipeline_mode<synchronous>, transform_indices = @transform_0, window_bounds = array<i64: 4, 16>}, {pipeline_mode = #tpu.pipeline_mode<synchronous>, transform_indices = @transform_1, window_bounds = array<i64: 16, 4>}, {transform_indices = @transform_2, window_bounds = array<i64: 6, 16, 16>}, {transform_indices = @transform_3, window_bounds = array<i64: 6, 4, 4>}]} {
    %c0 = arith.constant 0 : index
    %c0_0 = arith.constant 0 : index
    %0 = vector.load %arg1[%c0, %c0_0] : memref<4x16xbf16, #tpu.memory_space<vmem>>, vector<4x16xbf16>
    %c0_1 = arith.constant 0 : index
    %c0_2 = arith.constant 0 : index
    %c0_3 = arith.constant 0 : index
    %1 = vector.load %arg3[%c0_1, %c0_2, %c0_3] : memref<6x16x16xbf16, #tpu.memory_space<vmem>>, vector<1x16x16xbf16>
    %2 = vector.shape_cast %1 : vector<1x16x16xbf16> to vector<16x16xbf16>
    %cst = arith.constant dense<0.000000e+00> : vector<4x16xf32>
    %3 = tpu.matmul %0, %2, %cst {dimension_numbers = #tpu.dot_dimension_numbers<[1], [0], [0], [1], [0, 0, 1, 1], [], []>} : vector<4x16xbf16>, vector<16x16xbf16>, vector<4x16xf32> -> vector<4x16xf32>
    %4 = arith.truncf %3 : vector<4x16xf32> to vector<4x16xbf16>
    %c0_4 = arith.constant 0 : index
    %c0_5 = arith.constant 0 : index
    %5 = vector.load %arg2[%c0_4, %c0_5] : memref<16x4xbf16, #tpu.memory_space<vmem>>, vector<16x4xbf16>
    %cst_6 = arith.constant dense<0.000000e+00> : vector<4x4xf32>
    %6 = tpu.matmul %4, %5, %cst_6 {dimension_numbers = #tpu.dot_dimension_numbers<[1], [0], [0], [1], [0, 0, 1, 1], [], []>} : vector<4x16xbf16>, vector<16x4xbf16>, vector<4x4xf32> -> vector<4x4xf32>
    %c0_7 = arith.constant 0 : index
    %c0_8 = arith.constant 0 : index
    %c0_9 = arith.constant 0 : index
    %7 = vector.load %arg4[%c0_7, %c0_8, %c0_9] : memref<6x4x4xf32, #tpu.memory_space<vmem>>, vector<1x4x4xf32>
    %8 = vector.shape_cast %7 : vector<1x4x4xf32> to vector<4x4xf32>
    %9 = vector.shape_cast %6 : vector<4x4xf32> to vector<1x4x4xf32>
    tpu.vector_store %arg4[%c0_7, %c0_8, %c0_9], %9 {strides = array<i32>} : memref<6x4x4xf32, #tpu.memory_space<vmem>>, vector<1x4x4xf32>,
    %c0_10 = arith.constant 0 : index
    %c0_11 = arith.constant 0 : index
    %10 = vector.load %arg1[%c0_10, %c0_11] : memref<4x16xbf16, #tpu.memory_space<vmem>>, vector<4x16xbf16>
    %c1 = arith.constant 1 : index
    %c0_12 = arith.constant 0 : index
    %c0_13 = arith.constant 0 : index
    %11 = vector.load %arg3[%c1, %c0_12, %c0_13] : memref<6x16x16xbf16, #tpu.memory_space<vmem>>, vector<1x16x16xbf16>
    %12 = vector.shape_cast %11 : vector<1x16x16xbf16> to vector<16x16xbf16>
    %cst_14 = arith.constant dense<0.000000e+00> : vector<4x16xf32>
    %13 = tpu.matmul %10, %12, %cst_14 {dimension_numbers = #tpu.dot_dimension_numbers<[1], [0], [0], [1], [0, 0, 1, 1], [], []>} : vector<4x16xbf16>, vector<16x16xbf16>, vector<4x16xf32> -> vector<4x16xf32>
    %14 = arith.truncf %13 : vector<4x16xf32> to vector<4x16xbf16>
    %c0_15 = arith.constant 0 : index
    %c0_16 = arith.constant 0 : index
    %15 = vector.load %arg2[%c0_15, %c0_16] : memref<16x4xbf16, #tpu.memory_space<vmem>>, vector<16x4xbf16>
    %cst_17 = arith.constant dense<0.000000e+00> : vector<4x4xf32>
    %16 = tpu.matmul %14, %15, %cst_17 {dimension_numbers = #tpu.dot_dimension_numbers<[1], [0], [0], [1], [0, 0, 1, 1], [], []>} : vector<4x16xbf16>, vector<16x4xbf16>, vector<4x4xf32> -> vector<4x4xf32>
    %c1_18 = arith.constant 1 : index
    %c0_19 = arith.constant 0 : index
    %c0_20 = arith.constant 0 : index
    %17 = vector.load %arg4[%c1_18, %c0_19, %c0_20] : memref<6x4x4xf32, #tpu.memory_space<vmem>>, vector<1x4x4xf32>
    %18 = vector.shape_cast %17 : vector<1x4x4xf32> to vector<4x4xf32>
    %19 = vector.shape_cast %16 : vector<4x4xf32> to vector<1x4x4xf32>
    tpu.vector_store %arg4[%c1_18, %c0_19, %c0_20], %19 {strides = array<i32>} : memref<6x4x4xf32, #tpu.memory_space<vmem>>, vector<1x4x4xf32>,
    %c0_21 = arith.constant 0 : index
    %c0_22 = arith.constant 0 : index
    %20 = vector.load %arg1[%c0_21, %c0_22] : memref<4x16xbf16, #tpu.memory_space<vmem>>, vector<4x16xbf16>
    %c2 = arith.constant 2 : index
    %c0_23 = arith.constant 0 : index
    %c0_24 = arith.constant 0 : index
    %21 = vector.load %arg3[%c2, %c0_23, %c0_24] : memref<6x16x16xbf16, #tpu.memory_space<vmem>>, vector<1x16x16xbf16>
    %22 = vector.shape_cast %21 : vector<1x16x16xbf16> to vector<16x16xbf16>
    %cst_25 = arith.constant dense<0.000000e+00> : vector<4x16xf32>
    %23 = tpu.matmul %20, %22, %cst_25 {dimension_numbers = #tpu.dot_dimension_numbers<[1], [0], [0], [1], [0, 0, 1, 1], [], []>} : vector<4x16xbf16>, vector<16x16xbf16>, vector<4x16xf32> -> vector<4x16xf32>
    %24 = arith.truncf %23 : vector<4x16xf32> to vector<4x16xbf16>
    %c0_26 = arith.constant 0 : index
    %c0_27 = arith.constant 0 : index
    %25 = vector.load %arg2[%c0_26, %c0_27] : memref<16x4xbf16, #tpu.memory_space<vmem>>, vector<16x4xbf16>
    %cst_28 = arith.constant dense<0.000000e+00> : vector<4x4xf32>
    %26 = tpu.matmul %24, %25, %cst_28 {dimension_numbers = #tpu.dot_dimension_numbers<[1], [0], [0], [1], [0, 0, 1, 1], [], []>} : vector<4x16xbf16>, vector<16x4xbf16>, vector<4x4xf32> -> vector<4x4xf32>
    %c2_29 = arith.constant 2 : index
    %c0_30 = arith.constant 0 : index
    %c0_31 = arith.constant 0 : index
    %27 = vector.load %arg4[%c2_29, %c0_30, %c0_31] : memref<6x4x4xf32, #tpu.memory_space<vmem>>, vector<1x4x4xf32>
    %28 = vector.shape_cast %27 : vector<1x4x4xf32> to vector<4x4xf32>
    %29 = vector.shape_cast %26 : vector<4x4xf32> to vector<1x4x4xf32>
    tpu.vector_store %arg4[%c2_29, %c0_30, %c0_31], %29 {strides = array<i32>} : memref<6x4x4xf32, #tpu.memory_space<vmem>>, vector<1x4x4xf32>,
    %c0_32 = arith.constant 0 : index
    %c0_33 = arith.constant 0 : index
    %30 = vector.load %arg1[%c0_32, %c0_33] : memref<4x16xbf16, #tpu.memory_space<vmem>>, vector<4x16xbf16>
    %c3 = arith.constant 3 : index
    %c0_34 = arith.constant 0 : index
    %c0_35 = arith.constant 0 : index
    %31 = vector.load %arg3[%c3, %c0_34, %c0_35] : memref<6x16x16xbf16, #tpu.memory_space<vmem>>, vector<1x16x16xbf16>
    %32 = vector.shape_cast %31 : vector<1x16x16xbf16> to vector<16x16xbf16>
    %cst_36 = arith.constant dense<0.000000e+00> : vector<4x16xf32>
    %33 = tpu.matmul %30, %32, %cst_36 {dimension_numbers = #tpu.dot_dimension_numbers<[1], [0], [0], [1], [0, 0, 1, 1], [], []>} : vector<4x16xbf16>, vector<16x16xbf16>, vector<4x16xf32> -> vector<4x16xf32>
    %34 = arith.truncf %33 : vector<4x16xf32> to vector<4x16xbf16>
    %c0_37 = arith.constant 0 : index
    %c0_38 = arith.constant 0 : index
    %35 = vector.load %arg2[%c0_37, %c0_38] : memref<16x4xbf16, #tpu.memory_space<vmem>>, vector<16x4xbf16>
    %cst_39 = arith.constant dense<0.000000e+00> : vector<4x4xf32>
    %36 = tpu.matmul %34, %35, %cst_39 {dimension_numbers = #tpu.dot_dimension_numbers<[1], [0], [0], [1], [0, 0, 1, 1], [], []>} : vector<4x16xbf16>, vector<16x4xbf16>, vector<4x4xf32> -> vector<4x4xf32>
    %c3_40 = arith.constant 3 : index
    %c0_41 = arith.constant 0 : index
    %c0_42 = arith.constant 0 : index
    %37 = vector.load %arg4[%c3_40, %c0_41, %c0_42] : memref<6x4x4xf32, #tpu.memory_space<vmem>>, vector<1x4x4xf32>
    %38 = vector.shape_cast %37 : vector<1x4x4xf32> to vector<4x4xf32>
    %39 = vector.shape_cast %36 : vector<4x4xf32> to vector<1x4x4xf32>
    tpu.vector_store %arg4[%c3_40, %c0_41, %c0_42], %39 {strides = array<i32>} : memref<6x4x4xf32, #tpu.memory_space<vmem>>, vector<1x4x4xf32>,
    %c0_43 = arith.constant 0 : index
    %c0_44 = arith.constant 0 : index
    %40 = vector.load %arg1[%c0_43, %c0_44] : memref<4x16xbf16, #tpu.memory_space<vmem>>, vector<4x16xbf16>
    %c4 = arith.constant 4 : index
    %c0_45 = arith.constant 0 : index
    %c0_46 = arith.constant 0 : index
    %41 = vector.load %arg3[%c4, %c0_45, %c0_46] : memref<6x16x16xbf16, #tpu.memory_space<vmem>>, vector<1x16x16xbf16>
    %42 = vector.shape_cast %41 : vector<1x16x16xbf16> to vector<16x16xbf16>
    %cst_47 = arith.constant dense<0.000000e+00> : vector<4x16xf32>
    %43 = tpu.matmul %40, %42, %cst_47 {dimension_numbers = #tpu.dot_dimension_numbers<[1], [0], [0], [1], [0, 0, 1, 1], [], []>} : vector<4x16xbf16>, vector<16x16xbf16>, vector<4x16xf32> -> vector<4x16xf32>
    %44 = arith.truncf %43 : vector<4x16xf32> to vector<4x16xbf16>
    %c0_48 = arith.constant 0 : index
    %c0_49 = arith.constant 0 : index
    %45 = vector.load %arg2[%c0_48, %c0_49] : memref<16x4xbf16, #tpu.memory_space<vmem>>, vector<16x4xbf16>
    %cst_50 = arith.constant dense<0.000000e+00> : vector<4x4xf32>
    %46 = tpu.matmul %44, %45, %cst_50 {dimension_numbers = #tpu.dot_dimension_numbers<[1], [0], [0], [1], [0, 0, 1, 1], [], []>} : vector<4x16xbf16>, vector<16x4xbf16>, vector<4x4xf32> -> vector<4x4xf32>
    %c4_51 = arith.constant 4 : index
    %c0_52 = arith.constant 0 : index
    %c0_53 = arith.constant 0 : index
    %47 = vector.load %arg4[%c4_51, %c0_52, %c0_53] : memref<6x4x4xf32, #tpu.memory_space<vmem>>, vector<1x4x4xf32>
    %48 = vector.shape_cast %47 : vector<1x4x4xf32> to vector<4x4xf32>
    %49 = vector.shape_cast %46 : vector<4x4xf32> to vector<1x4x4xf32>
    tpu.vector_store %arg4[%c4_51, %c0_52, %c0_53], %49 {strides = array<i32>} : memref<6x4x4xf32, #tpu.memory_space<vmem>>, vector<1x4x4xf32>,
    %c0_54 = arith.constant 0 : index
    %c0_55 = arith.constant 0 : index
    %50 = vector.load %arg1[%c0_54, %c0_55] : memref<4x16xbf16, #tpu.memory_space<vmem>>, vector<4x16xbf16>
    %c5 = arith.constant 5 : index
    %c0_56 = arith.constant 0 : index
    %c0_57 = arith.constant 0 : index
    %51 = vector.load %arg3[%c5, %c0_56, %c0_57] : memref<6x16x16xbf16, #tpu.memory_space<vmem>>, vector<1x16x16xbf16>
    %52 = vector.shape_cast %51 : vector<1x16x16xbf16> to vector<16x16xbf16>
    %cst_58 = arith.constant dense<0.000000e+00> : vector<4x16xf32>
    %53 = tpu.matmul %50, %52, %cst_58 {dimension_numbers = #tpu.dot_dimension_numbers<[1], [0], [0], [1], [0, 0, 1, 1], [], []>} : vector<4x16xbf16>, vector<16x16xbf16>, vector<4x16xf32> -> vector<4x16xf32>
    %54 = arith.truncf %53 : vector<4x16xf32> to vector<4x16xbf16>
    %c0_59 = arith.constant 0 : index
    %c0_60 = arith.constant 0 : index
    %55 = vector.load %arg2[%c0_59, %c0_60] : memref<16x4xbf16, #tpu.memory_space<vmem>>, vector<16x4xbf16>
    %cst_61 = arith.constant dense<0.000000e+00> : vector<4x4xf32>
    %56 = tpu.matmul %54, %55, %cst_61 {dimension_numbers = #tpu.dot_dimension_numbers<[1], [0], [0], [1], [0, 0, 1, 1], [], []>} : vector<4x16xbf16>, vector<16x4xbf16>, vector<4x4xf32> -> vector<4x4xf32>
    %c5_62 = arith.constant 5 : index
    %c0_63 = arith.constant 0 : index
    %c0_64 = arith.constant 0 : index
    %57 = vector.load %arg4[%c5_62, %c0_63, %c0_64] : memref<6x4x4xf32, #tpu.memory_space<vmem>>, vector<1x4x4xf32>
    %58 = vector.shape_cast %57 : vector<1x4x4xf32> to vector<4x4xf32>
    %59 = vector.shape_cast %56 : vector<4x4xf32> to vector<1x4x4xf32>
    tpu.vector_store %arg4[%c5_62, %c0_63, %c0_64], %59 {strides = array<i32>} : memref<6x4x4xf32, #tpu.memory_space<vmem>>, vector<1x4x4xf32>,
    return
  }
  func.func @transform_0(%arg0: i32) -> (i32, i32) {
    %c0_i32 = arith.constant 0 : i32
    %c0_i32_0 = arith.constant 0 : i32
    %c0_i32_1 = arith.constant 0 : i32
    return %c0_i32, %c0_i32_0 : i32, i32
  }
  func.func @transform_1(%arg0: i32) -> (i32, i32) {
    %c0_i32 = arith.constant 0 : i32
    %c0_i32_0 = arith.constant 0 : i32
    %c0_i32_1 = arith.constant 0 : i32
    return %c0_i32, %c0_i32_0 : i32, i32
  }
  func.func @transform_2(%arg0: i32) -> (i32, i32, i32) {
    %c0_i32 = arith.constant 0 : i32
    %c0_i32_0 = arith.constant 0 : i32
    %c0_i32_1 = arith.constant 0 : i32
    return %arg0, %c0_i32, %c0_i32_0 : i32, i32, i32
  }
  func.func @transform_3(%arg0: i32) -> (i32, i32, i32) {
    %c0_i32 = arith.constant 0 : i32
    %c0_i32_0 = arith.constant 0 : i32
    %c0_i32_1 = arith.constant 0 : i32
    return %arg0, %c0_i32, %c0_i32_0 : i32, i32, i32
  }
}

</mosaic_0001>

<bundles_post_ra>
// kernel: tpu_custom_call.1
= control target key start
LH: loop header
LB: loop body
LE: loop exit
PB: predicated region body
PF: predicated region fallthrough
CT: control target
= control target key end

     0   :  { %8 = vsyncpa [#allocation3], 0  ;;  %s842_s12 = smov [#allocation2]   ;;  %s987_s0 = inlined_call_operand.vmem [shape: bf16[4,16], index: 0, kind: input, shape index: {}]   ;;  %s988_s1 = inlined_call_operand.vmem [shape: bf16[16,4], index: 1, kind: input, shape index: {}]   ;;  %s989_s2 = inlined_call_operand.hbm [shape: bf16[6,16,16], index: 2, kind: input, shape index: {}]   ;;  %s990_s3 = inlined_call_operand.vmem [shape: f32[6,4,4], index: 3, kind: output, shape index: {}]  }
   0x1   :  { %s18_s13 = sshll.u32 %s842_s12, 4  ;;  %s818_s16 = scalar_lea.hbm %s989_s2, 768  ;;  %s19_s13 = int_to_ptr.vmem [resolvable:$true] %s18_s13 }
   0x2   :  { %p819_p0 = scmp.ne.s32.totalorder %s989_s2, %s818_s16  ;;  %p822_p1 = scmp.lt.u32.totalorder %s818_s16, %s989_s2 }
   0x4   :  { %p824_p2 = pnand %p822_p1, %p819_p0 }
   0x6   :  { %827 = shalt.err (!%p824_p2)
}
   0x7   :  { %s828_s21 = scalar_lea.vmem %s19_s13, 768  ;;  %p833_p4 = scmp.lt.s32.totalorder %s19_s13, %s19_s13 }
   0x8   :  { %p829_p3 = scmp.ne.s32.totalorder %s19_s13, %s828_s21  ;;  %p834_p5 = scmp.lt.s32.totalorder %s828_s21, %s828_s21 }
   0xa   :  { %p835_p6 = por %p834_p5, %p833_p4 }
   0xc   :  { %p836_p7 = pnand %p835_p6, %p829_p3 }
   0xe   :  { %839 = shalt.err (!%p836_p7)
}
   0xf   :  { %s843_s22 = smov 64   ;;  %s844_s23 = smov 4  }
  0x10   :  { %24 = dma.hbm_to_vmem [thread:$0]  %s989_s2, 768, %s19_s13, [#allocation3], %s843_s22, %s843_s22, %s844_s23  }
  0x11   :  { %840 = dma.done.wait [#allocation3], 768  }
  0x12   :  { %841 = vsyncadd [#allocation3], 4294966528  ;;  %v845_v0 = vmov 0.0   ;;  %vm846_vm0 = vmmov 0   ;;  %v806_v1 = vld [vmem:[#allocation2] sm:$0xff]   ;;  %vm38_vm1 = vcmask 130048  }
  0x13   :  { %729 = vmatprep.subr.bf16.mxu0 %v845_v0  ;;  %731 = vmatprep.mubr.msk.bf16.mxu0 %vm846_vm0, %v845_v0  ;;  %v29_v2 = vld [vmem:[%s987_s0] sm:$0x3]  ;;  %v807_v3 = vld [vmem:[#allocation2 + $0x8] sm:$0xff]   ;;  %v808_v5 = vld [vmem:[#allocation2 + $0x10] sm:$0xff]   ;;  %vm134_vm2 = vcmask 27648  }
  0x14   :  { %735 = vmatprep.subr.bf16.mxu1 %v845_v0  ;;  %737 = vmatprep.mubr.msk.bf16.mxu1 %vm846_vm0, %v845_v0  ;;  %v136_v4 = vld [vmem:[%s987_s0] sm:$0x3]  ;;  %v809_v7 = vld [vmem:[#allocation2 + $0x18] sm:$0xff]   ;;  %v811_v11 = vld [vmem:[#allocation2 + $0x28] sm:$0xff]  }
  0x15   :  { %730 = vmatpush3.bf16.msra.mxu0 %v806_v1  ;;  %v243_v6 = vld [vmem:[%s987_s0] sm:$0x3] }
  0x16   :  { %741 = vmatprep.subr.bf16.mxu0 %v845_v0  ;;  %v350_v8 = vld [vmem:[%s987_s0] sm:$0x3] }
  0x17   :  { %v810_v9 = vld [vmem:[#allocation2 + $0x20] sm:$0xff]  }
  0x18   :  { %732 = vmatmul.mubr.msk.bf16.vlgmr.msra.gmra.mrb[0].mxu0 %vm38_vm1, %v29_v2  ;;  %v457_v10 = vld [vmem:[%s987_s0] sm:$0x3] }
  0x19   :  { %742 = vmatpush3.bf16.msra.mxu0 %v807_v3  ;;  %743 = vmatprep.mubr.msk.bf16.mxu0 %vm846_vm0, %v845_v0  ;;  %v564_v12 = vld [vmem:[%s987_s0] sm:$0x3] }
  0x1a   :  { %753 = vmatprep.subr.bf16.mxu0 %v845_v0  ;;  %v812_v13 = vld [vmem:[%s988_s1] sm:$0xff]  }
  0x1b   :  { %736 = vmatpush3.bf16.msra.mxu1 %v812_v13  ;;  %v813_v15 = vld [vmem:[%s988_s1] sm:$0xff]  }
  0x1c   :  { %747 = vmatprep.subr.bf16.mxu1 %v845_v0  ;;  %v814_v21 = vld [vmem:[%s988_s1] sm:$0xff]  }
  0x1d   :  { %v815_v27 = vld [vmem:[%s988_s1] sm:$0xff]  }
  0x1e   :  { %v816_v33 = vld [vmem:[%s988_s1] sm:$0xff]  }
  0x1f   :  { %v817_v39 = vld [vmem:[%s988_s1] sm:$0xff]  }
  0x20   :  { %744 = vmatmul.mubr.msk.bf16.vlgmr.msra.gmra.mrb[4].mxu0 %vm38_vm1, %v136_v4 }
  0x21   :  { %754 = vmatpush3.bf16.msra.mxu0 %v808_v5  ;;  %755 = vmatprep.mubr.msk.bf16.mxu0 %vm846_vm0, %v845_v0 }
  0x22   :  { %765 = vmatprep.subr.bf16.mxu0 %v845_v0 }
  0x28   :  { %756 = vmatmul.mubr.msk.bf16.vlgmr.msra.gmra.mrb[8].mxu0 %vm38_vm1, %v243_v6 }
  0x29   :  { %766 = vmatpush3.bf16.msra.mxu0 %v809_v7  ;;  %767 = vmatprep.mubr.msk.bf16.mxu0 %vm846_vm0, %v845_v0 }
  0x2a   :  { %777 = vmatprep.subr.bf16.mxu0 %v845_v0 }
  0x30   :  { %768 = vmatmul.mubr.msk.bf16.vlgmr.msra.gmra.mrb[12].mxu0 %vm38_vm1, %v350_v8 }
  0x31   :  { %778 = vmatpush3.bf16.msra.mxu0 %v810_v9  ;;  %779 = vmatprep.mubr.msk.bf16.mxu0 %vm846_vm0, %v845_v0 }
  0x32   :  { %789 = vmatprep.subr.bf16.mxu0 %v845_v0 }
  0x38   :  { %780 = vmatmul.mubr.msk.bf16.vlgmr.msra.gmra.mrb[16].mxu0 %vm38_vm1, %v457_v10 }
  0x39   :  { %790 = vmatpush3.bf16.msra.mxu0 %v811_v11  ;;  %791 = vmatprep.mubr.msk.bf16.mxu0 %vm846_vm0, %v845_v0 }
  0x40   :  { %792 = vmatmul.mubr.msk.bf16.vlgmr.msra.gmra.mrb[20].mxu0 %vm38_vm1, %v564_v12 }
  0xeb   :  { %v76_v14 = vpop.f32.mrb[0].mxu0 }
  0xec   :  { %v82_v16 = vpack.c.bf16 %v76_v14, %v76_v14  ;;  %v733_v17 = vpop.f32.mrb[1].mxu0 }
  0xed   :  { %v79_v18 = vpop.f32.mrb[2].mxu0 }
  0xee   :  { %v734_v19 = vpop.f32.mrb[3].mxu0  ;;  %738 = vmatmul.mubr.msk.bf16.vlgmr.msra.gmra.mrb[0].mxu1 %vm38_vm1, %v82_v16 }
  0xef   :  { %748 = vmatpush3.bf16.msra.mxu1 %v813_v15  ;;  %749 = vmatprep.mubr.msk.bf16.mxu1 %vm846_vm0, %v845_v0 }
  0xf0   :  { %759 = vmatprep.subr.bf16.mxu1 %v845_v0 }
  0xf3   :  { %v183_v20 = vpop.f32.mrb[4].mxu0 }
  0xf4   :  { %v189_v22 = vpack.c.bf16 %v183_v20, %v183_v20  ;;  %v745_v23 = vpop.f32.mrb[5].mxu0 }
  0xf5   :  { %v186_v24 = vpop.f32.mrb[6].mxu0 }
  0xf6   :  { %v746_v25 = vpop.f32.mrb[7].mxu0  ;;  %750 = vmatmul.mubr.msk.bf16.vlgmr.msra.gmra.mrb[4].mxu1 %vm38_vm1, %v189_v22 }
  0xf7   :  { %760 = vmatpush3.bf16.msra.mxu1 %v814_v21  ;;  %761 = vmatprep.mubr.msk.bf16.mxu1 %vm846_vm0, %v845_v0 }
  0xf8   :  { %771 = vmatprep.subr.bf16.mxu1 %v845_v0 }
  0xfb   :  { %v290_v26 = vpop.f32.mrb[8].mxu0 }
  0xfc   :  { %v296_v28 = vpack.c.bf16 %v290_v26, %v290_v26  ;;  %v757_v29 = vpop.f32.mrb[9].mxu0 }
  0xfd   :  { %v293_v30 = vpop.f32.mrb[10].mxu0 }
  0xfe   :  { %v758_v31 = vpop.f32.mrb[11].mxu0  ;;  %762 = vmatmul.mubr.msk.bf16.vlgmr.msra.gmra.mrb[8].mxu1 %vm38_vm1, %v296_v28 }
  0xff   :  { %772 = vmatpush3.bf16.msra.mxu1 %v815_v27  ;;  %773 = vmatprep.mubr.msk.bf16.mxu1 %vm846_vm0, %v845_v0 }
 0x100   :  { %783 = vmatprep.subr.bf16.mxu1 %v845_v0 }
 0x103   :  { %v397_v32 = vpop.f32.mrb[12].mxu0 }
 0x104   :  { %v403_v34 = vpack.c.bf16 %v397_v32, %v397_v32  ;;  %v769_v35 = vpop.f32.mrb[13].mxu0 }
 0x105   :  { %v400_v36 = vpop.f32.mrb[14].mxu0 }
 0x106   :  { %v770_v37 = vpop.f32.mrb[15].mxu0  ;;  %774 = vmatmul.mubr.msk.bf16.vlgmr.msra.gmra.mrb[12].mxu1 %vm38_vm1, %v403_v34 }
 0x107   :  { %784 = vmatpush3.bf16.msra.mxu1 %v816_v33  ;;  %785 = vmatprep.mubr.msk.bf16.mxu1 %vm846_vm0, %v845_v0 }
 0x108   :  { %795 = vmatprep.subr.bf16.mxu1 %v845_v0 }
 0x10b   :  { %v504_v38 = vpop.f32.mrb[16].mxu0 }
 0x10c   :  { %v510_v40 = vpack.c.bf16 %v504_v38, %v504_v38  ;;  %v781_v41 = vpop.f32.mrb[17].mxu0 }
 0x10d   :  { %v507_v42 = vpop.f32.mrb[18].mxu0 }
 0x10e   :  { %v782_v43 = vpop.f32.mrb[19].mxu0  ;;  %786 = vmatmul.mubr.msk.bf16.vlgmr.msra.gmra.mrb[16].mxu1 %vm38_vm1, %v510_v40 }
 0x10f   :  { %796 = vmatpush3.bf16.msra.mxu1 %v817_v39  ;;  %797 = vmatprep.mubr.msk.bf16.mxu1 %vm846_vm0, %v845_v0 }
 0x113   :  { %v611_v44 = vpop.f32.mrb[20].mxu0 }
 0x114   :  { %v617_v45 = vpack.c.bf16 %v611_v44, %v611_v44  ;;  %v793_v46 = vpop.f32.mrb[21].mxu0 }
 0x115   :  { %v614_v47 = vpop.f32.mrb[22].mxu0 }
 0x116   :  { %v794_v48 = vpop.f32.mrb[23].mxu0  ;;  %798 = vmatmul.mubr.msk.bf16.vlgmr.msra.gmra.mrb[20].mxu1 %vm38_vm1, %v617_v45 }
 0x1c1   :  { %v128_v49 = vpop.f32.mrb[0].mxu1 }
 0x1c2   :  { %135 = vst.msk [vmem:[%s990_s3] sm:$0xf] %vm134_vm2, %v128_v49  ;;  %v739_v50 = vpop.f32.mrb[1].mxu1 }
 0x1c3   :  { %v131_v51 = vpop.f32.mrb[2].mxu1 }
 0x1c4   :  { %v740_v52 = vpop.f32.mrb[3].mxu1 }
 0x1c9   :  { %v235_v53 = vpop.f32.mrb[4].mxu1 }
 0x1ca   :  { %684 = vst.msk [vmem:[%s990_s3 + $0x4] sm:$0xf] %vm134_vm2, %v235_v53  ;;  %v751_v54 = vpop.f32.mrb[5].mxu1 }
 0x1cb   :  { %v238_v55 = vpop.f32.mrb[6].mxu1 }
 0x1cc   :  { %v752_v56 = vpop.f32.mrb[7].mxu1 }
 0x1d1   :  { %v342_v57 = vpop.f32.mrb[8].mxu1 }
 0x1d2   :  { %689 = vst.msk [vmem:[%s990_s3 + $0x8] sm:$0xf] %vm134_vm2, %v342_v57  ;;  %v763_v58 = vpop.f32.mrb[9].mxu1 }
 0x1d3   :  { %v345_v59 = vpop.f32.mrb[10].mxu1 }
 0x1d4   :  { %v764_v60 = vpop.f32.mrb[11].mxu1 }
 0x1d9   :  { %v449_v61 = vpop.f32.mrb[12].mxu1 }
 0x1da   :  { %694 = vst.msk [vmem:[%s990_s3 + $0xc] sm:$0xf] %vm134_vm2, %v449_v61  ;;  %v775_v62 = vpop.f32.mrb[13].mxu1 }
 0x1db   :  { %v452_v63 = vpop.f32.mrb[14].mxu1 }
 0x1dc   :  { %v776_v0 = vpop.f32.mrb[15].mxu1 }
 0x1e1   :  { %v556_v1 = vpop.f32.mrb[16].mxu1 }
 0x1e2   :  { %699 = vst.msk [vmem:[%s990_s3 + $0x10] sm:$0xf] %vm134_vm2, %v556_v1  ;;  %v787_v2 = vpop.f32.mrb[17].mxu1 }
 0x1e3   :  { %v559_v3 = vpop.f32.mrb[18].mxu1 }
 0x1e4   :  { %v788_v4 = vpop.f32.mrb[19].mxu1 }
 0x1e9   :  { %v663_v5 = vpop.f32.mrb[20].mxu1 }
 0x1ea   :  { %704 = vst.msk [vmem:[%s990_s3 + $0x14] sm:$0xf] %vm134_vm2, %v663_v5  ;;  %v799_v6 = vpop.f32.mrb[21].mxu1 }
 0x1eb   :  { %v666_v7 = vpop.f32.mrb[22].mxu1 }
 0x1ec   :  { %v800_v8 = vpop.f32.mrb[23].mxu1 }
 0x1ed   :  { %675 = vsyncpa [#allocation3], 1 }

</bundles_post_ra>
